<compile_context>
chip_gen: v5e
topology: v5e:2x2
jax: 0.10.0
libtpu: 0.0.40
codegen_flags: <defaults>
</compile_context>

<pallas_src>
import functools

import jax
import jax.numpy as jnp
from jax.experimental import pallas as pl
from jax.experimental.pallas import tpu as pltpu

LANE = 128
MAX_TILE_ROWS = 2048  # (2048, 128) f32 block = 1 MiB per input


def _round_up(v, m):
    return ((v + m - 1) // m) * m


def _wbce_dice_sums_kernel(*refs, p_valid, need_mask, has_weight):
    if has_weight:
        x_ref, t_ref, w_ref, out_ref, acc_ref = refs
    else:
        x_ref, t_ref, out_ref, acc_ref = refs
        w_ref = None

    i = pl.program_id(1)

    @pl.when(i == 0)
    def _init():
        acc_ref[...] = jnp.zeros_like(acc_ref)

    x = x_ref[0].astype(jnp.float32)   # (tile_rows, LANE)
    t = t_ref[0].astype(jnp.float32)

    if need_mask:
        tr, lanes = x.shape
        row_ids = jax.lax.broadcasted_iota(jnp.int32, (tr, lanes), 0)
        lane_ids = jax.lax.broadcasted_iota(jnp.int32, (tr, lanes), 1)
        flat = (i * tr + row_ids) * lanes + lane_ids
        valid = flat < p_valid
        vf = valid.astype(jnp.float32)
        x = jnp.where(valid, x, 0.0)
        t = jnp.where(valid, t, 0.0)
    else:
        valid = None
        vf = None

    # BCEWithLogitsLoss(reduce=False) on the raw logits (stable form).
    bce = jnp.maximum(x, 0.0) - x * t + jnp.log1p(jnp.exp(-jnp.abs(x)))

    if has_weight:
        w = w_ref[0].astype(jnp.float32)
        if need_mask:
            w = jnp.where(valid, w, 0.0)
        bce_w = bce * w
    else:
        bce_w = bce * vf if need_mask else bce

    s = jax.nn.sigmoid(x)                 # dice probabilities
    s_m = s * vf if need_mask else s      # mask: sigmoid(0)=0.5 on padding
    inter = s * t                         # t already zeroed on padding

    # Lane-parallel partial sums accumulated in VMEM; cross-lane reduce is
    # deferred to the (tiny) JAX epilogue.
    acc_ref[0:1, :] += jnp.sum(bce_w, axis=0, keepdims=True)
    acc_ref[1:2, :] += jnp.sum(inter, axis=0, keepdims=True)
    acc_ref[2:3, :] += jnp.sum(s_m, axis=0, keepdims=True)
    acc_ref[3:4, :] += jnp.sum(t, axis=0, keepdims=True)

    @pl.when(i == pl.num_programs(1) - 1)
    def _done():
        out_ref[0] = acc_ref[...]


def weighted_bce_dice_loss(logits, targets, weight=None):
    """Pallas implementation of WeightedBceDiceLoss.forward (returns a scalar)."""
    x = jnp.squeeze(logits)
    t = jnp.squeeze(targets)
    b = x.shape[0]
    p = x.size // b

    x2 = x.reshape(b, p)
    t2 = t.reshape(b, p)

    has_weight = weight is not None
    if has_weight:
        # weight must be broadcastable to the squeezed logits shape (typical use).
        w2 = jnp.broadcast_to(weight, x.shape).reshape(b, p)

    # Pad each sample only up to an (8, 128)-aligned row count (tiny; the big
    # tile alignment is handled by in-kernel masking, not host-side copies).
    rows = _round_up(_round_up(p, LANE) // LANE, 8)
    p_pad = rows * LANE
    if p_pad != p:
        pad = ((0, 0), (0, p_pad - p))
        x2 = jnp.pad(x2, pad)
        t2 = jnp.pad(t2, pad)
        if has_weight:
            w2 = jnp.pad(w2, pad)

    tile_rows = min(MAX_TILE_ROWS, rows)      # rows and 2048 are multiples of 8
    n_tiles = pl.cdiv(rows, tile_rows)
    need_mask = (p_pad != p) or (n_tiles * tile_rows != rows)

    x3 = x2.reshape(b, rows, LANE)
    t3 = t2.reshape(b, rows, LANE)
    ins = [x3, t3]
    if has_weight:
        ins.append(w2.reshape(b, rows, LANE))

    tile_spec = pl.BlockSpec((1, tile_rows, LANE), lambda bi, ti: (bi, ti, 0))

    kernel = functools.partial(
        _wbce_dice_sums_kernel,
        p_valid=p, need_mask=need_mask, has_weight=has_weight)

    # out[b, 0..3, :] = per-batch lane partial sums of [bce*w, s*t, s, t].
    sums3 = pl.pallas_call(
        kernel,
        out_shape=jax.ShapeDtypeStruct((b, 8, LANE), jnp.float32),
        grid=(b, n_tiles),
        in_specs=[tile_spec] * len(ins),
        out_specs=pl.BlockSpec((1, 8, LANE), lambda bi, ti: (bi, 0, 0)),
        scratch_shapes=[pltpu.VMEM((8, LANE), jnp.float32)],
        compiler_params=pltpu.CompilerParams(
            dimension_semantics=("parallel", "arbitrary")),
    )(*ins)

    # Tiny epilogue in plain JAX: cross-lane reduce + dice ratio + combine.
    sums = jnp.sum(sums3, axis=2)             # (b, 8)
    bce_mean = jnp.sum(sums[:, 0]) / jnp.float32(b * p)
    inter = sums[:, 1]
    m1 = sums[:, 2]
    m2 = sums[:, 3]
    smooth = jnp.float32(1.0)
    score = 2.0 * (inter + smooth) / (m1 + m2 + smooth)
    dice_loss = 1.0 - jnp.sum(score) / jnp.float32(b)
    return 1.5 * bce_mean + 0.5 * dice_loss


def _reference(logits, targets, weight=None):
    x = jnp.squeeze(logits).astype(jnp.float32)
    t = jnp.squeeze(targets).astype(jnp.float32)
    bce = jnp.maximum(x, 0.0) - x * t + jnp.log1p(jnp.exp(-jnp.abs(x)))
    if weight is None:
        wm = jnp.float32(1.0)
    else:
        wm = jnp.broadcast_to(weight, x.shape).astype(jnp.float32)
    bce_mean = jnp.mean(bce * wm)
    s = jax.nn.sigmoid(x)
    b = t.shape[0]
    m1 = s.reshape(b, -1)
    m2 = t.reshape(b, -1)
    inter = jnp.sum(m1 * m2, axis=1)
    score = 2.0 * (inter + 1.0) / (jnp.sum(m1, axis=1) + jnp.sum(m2, axis=1) + 1.0)
    dice_loss = 1.0 - jnp.sum(score) / b
    return 1.5 * bce_mean + 0.5 * dice_loss


if __name__ == "__main__":
    key = jax.random.PRNGKey(0)
    k1, k2, k3 = jax.random.split(key, 3)

    # Small NCHW-style inputs; squeeze drops the size-1 channel dim.
    logits = jax.random.normal(k1, (2, 1, 16, 16), dtype=jnp.float32)
    targets = (jax.random.uniform(k2, (2, 1, 16, 16)) > 0.5).astype(jnp.float32)
    # weight broadcastable to the squeezed (2, 16, 16) loss shape.
    weight = jax.random.uniform(k3, (2, 16, 16), dtype=jnp.float32)

    # With explicit weight.
    out_w = jax.block_until_ready(weighted_bce_dice_loss(logits, targets, weight))
    ref_w = _reference(logits, targets, weight)
    assert jnp.allclose(out_w, ref_w, rtol=1e-5, atol=1e-6), (out_w, ref_w)

    # weight=None path (no weight stream through the kernel).
    out_n = jax.block_until_ready(weighted_bce_dice_loss(logits, targets, None))
    ref_n = _reference(logits, targets, None)
    assert jnp.allclose(out_n, ref_n, rtol=1e-5, atol=1e-6), (out_n, ref_n)

    print("KERNEL_OK")
</pallas_src>

<mosaic_0001>
module attributes {stable_mosaic.version = 11 : i64} {
  func.func @_wbce_dice_sums_kernel(%arg0: i32, %arg1: i32, %arg2: memref<1x8x128xf32, #tpu.memory_space<vmem>>, %arg3: memref<1x8x128xf32, #tpu.memory_space<vmem>>, %arg4: memref<1x8x128xf32, #tpu.memory_space<vmem>>, %arg5: memref<1x8x128xf32, #tpu.memory_space<vmem>>, %arg6: memref<8x128xf32, #tpu.memory_space<vmem>>) attributes {dimension_semantics = [#tpu.dimension_semantics<parallel>, #tpu.dimension_semantics<arbitrary>], iteration_bounds = array<i64: 2, 1>, scalar_prefetch = 0 : i64, scratch_operands = 1 : i64, tpu.core_type = #tpu.core_type<tc>, window_params = [{transform_indices = @transform_0, window_bounds = array<i64: 1, 8, 128>}, {transform_indices = @transform_1, window_bounds = array<i64: 1, 8, 128>}, {transform_indices = @transform_2, window_bounds = array<i64: 1, 8, 128>}, {transform_indices = @transform_3, window_bounds = array<i64: 1, 8, 128>}]} {
    %c0_i32 = arith.constant 0 : i32
    %0 = arith.cmpi eq, %arg1, %c0_i32 : i32
    %1 = arith.extui %0 : i1 to i32
    %c0_i32_0 = arith.constant 0 : i32
    %2 = arith.cmpi ne, %1, %c0_i32_0 : i32
    scf.if %2 {
      %cst_33 = arith.constant 0.000000e+00 : f32
      %68 = vector.broadcast %cst_33 : f32 to vector<8x128xf32>
      %c0_34 = arith.constant 0 : index
      %c0_35 = arith.constant 0 : index
      %69 = vector.load %arg6[%c0_34, %c0_35] : memref<8x128xf32, #tpu.memory_space<vmem>>, vector<8x128xf32>
      tpu.vector_store %arg6[%c0_34, %c0_35], %68 {strides = array<i32>} : memref<8x128xf32, #tpu.memory_space<vmem>>, vector<8x128xf32>,
    } else {
    }
    %c0 = arith.constant 0 : index
    %c0_1 = arith.constant 0 : index
    %c0_2 = arith.constant 0 : index
    %3 = vector.load %arg2[%c0, %c0_1, %c0_2] : memref<1x8x128xf32, #tpu.memory_space<vmem>>, vector<1x8x128xf32>
    %4 = vector.shape_cast %3 : vector<1x8x128xf32> to vector<8x128xf32>
    %c0_3 = arith.constant 0 : index
    %c0_4 = arith.constant 0 : index
    %c0_5 = arith.constant 0 : index
    %5 = vector.load %arg3[%c0_3, %c0_4, %c0_5] : memref<1x8x128xf32, #tpu.memory_space<vmem>>, vector<1x8x128xf32>
    %6 = vector.shape_cast %5 : vector<1x8x128xf32> to vector<8x128xf32>
    %7 = tpu.iota {dimensions = array<i32: 0>} : vector<8x128xi32>
    %8 = tpu.iota {dimensions = array<i32: 1>} : vector<8x128xi32>
    %c8_i32 = arith.constant 8 : i32
    %9 = arith.muli %arg1, %c8_i32 : i32
    %10 = vector.broadcast %9 : i32 to vector<8x128xi32>
    %11 = arith.addi %10, %7 : vector<8x128xi32>
    %c128_i32 = arith.constant 128 : i32
    %12 = vector.broadcast %c128_i32 : i32 to vector<8x128xi32>
    %13 = arith.muli %11, %12 : vector<8x128xi32>
    %14 = arith.addi %13, %8 : vector<8x128xi32>
    %c256_i32 = arith.constant 256 : i32
    %15 = vector.broadcast %c256_i32 : i32 to vector<8x128xi32>
    %16 = arith.cmpi slt, %14, %15 : vector<8x128xi32>
    %17 = arith.extui %16 : vector<8x128xi1> to vector<8x128xi32>
    %18 = arith.sitofp %17 : vector<8x128xi32> to vector<8x128xf32>
    %cst = arith.constant 0.000000e+00 : f32
    %19 = vector.broadcast %cst : f32 to vector<8x128xf32>
    %20 = arith.select %16, %4, %19 : vector<8x128xi1>, vector<8x128xf32>
    %cst_6 = arith.constant 0.000000e+00 : f32
    %21 = vector.broadcast %cst_6 : f32 to vector<8x128xf32>
    %22 = arith.select %16, %6, %21 : vector<8x128xi1>, vector<8x128xf32>
    %cst_7 = arith.constant 0.000000e+00 : f32
    %23 = vector.broadcast %cst_7 : f32 to vector<8x128xf32>
    %24 = arith.maximumf %20, %23 : vector<8x128xf32>
    %25 = arith.mulf %20, %22 : vector<8x128xf32>
    %26 = arith.subf %24, %25 : vector<8x128xf32>
    %27 = math.absf %20 : vector<8x128xf32>
    %cst_8 = arith.constant 0.000000e+00 : f32
    %28 = vector.broadcast %cst_8 : f32 to vector<8x128xf32>
    %29 = arith.subf %28, %27 : vector<8x128xf32>
    %30 = math.exp %29 : vector<8x128xf32>
    %31 = math.log1p %30 : vector<8x128xf32>
    %32 = arith.addf %26, %31 : vector<8x128xf32>
    %c0_9 = arith.constant 0 : index
    %c0_10 = arith.constant 0 : index
    %c0_11 = arith.constant 0 : index
    %33 = vector.load %arg4[%c0_9, %c0_10, %c0_11] : memref<1x8x128xf32, #tpu.memory_space<vmem>>, vector<1x8x128xf32>
    %34 = vector.shape_cast %33 : vector<1x8x128xf32> to vector<8x128xf32>
    %cst_12 = arith.constant 0.000000e+00 : f32
    %35 = vector.broadcast %cst_12 : f32 to vector<8x128xf32>
    %36 = arith.select %16, %34, %35 : vector<8x128xi1>, vector<8x128xf32>
    %37 = arith.mulf %32, %36 : vector<8x128xf32>
    %38 = arith.negf %20 : vector<8x128xf32>
    %39 = math.exp %38 : vector<8x128xf32>
    %cst_13 = arith.constant 1.000000e+00 : f32
    %40 = vector.broadcast %cst_13 : f32 to vector<8x128xf32>
    %41 = arith.addf %40, %39 : vector<8x128xf32>
    %42 = arith.divf %40, %41 : vector<8x128xf32>
    %43 = arith.mulf %42, %18 : vector<8x128xf32>
    %44 = arith.mulf %42, %22 : vector<8x128xf32>
    %c0_14 = arith.constant 0 : index
    %c0_15 = arith.constant 0 : index
    %45 = vector.load %arg6[%c0_14, %c0_15] : memref<8x128xf32, #tpu.memory_space<vmem>>, vector<1x128xf32>
    %cst_16 = arith.constant dense<0.000000e+00> : vector<128xf32>
    %46 = vector.multi_reduction <add>, %37, %cst_16 [0] : vector<8x128xf32> to vector<128xf32>
    %47 = vector.shape_cast %46 : vector<128xf32> to vector<1x128xf32>
    %48 = arith.addf %45, %47 : vector<1x128xf32>
    %c0_17 = arith.constant 0 : index
    %c0_18 = arith.constant 0 : index
    %49 = vector.load %arg6[%c0_17, %c0_18] : memref<8x128xf32, #tpu.memory_space<vmem>>, vector<1x128xf32>
    tpu.vector_store %arg6[%c0_17, %c0_18], %48 {strides = array<i32>} : memref<8x128xf32, #tpu.memory_space<vmem>>, vector<1x128xf32>,
    %c1 = arith.constant 1 : index
    %c0_19 = arith.constant 0 : index
    %50 = vector.load %arg6[%c1, %c0_19] : memref<8x128xf32, #tpu.memory_space<vmem>>, vector<1x128xf32>
    %cst_20 = arith.constant dense<0.000000e+00> : vector<128xf32>
    %51 = vector.multi_reduction <add>, %44, %cst_20 [0] : vector<8x128xf32> to vector<128xf32>
    %52 = vector.shape_cast %51 : vector<128xf32> to vector<1x128xf32>
    %53 = arith.addf %50, %52 : vector<1x128xf32>
    %c1_21 = arith.constant 1 : index
    %c0_22 = arith.constant 0 : index
    %54 = vector.load %arg6[%c1_21, %c0_22] : memref<8x128xf32, #tpu.memory_space<vmem>>, vector<1x128xf32>
    tpu.vector_store %arg6[%c1_21, %c0_22], %53 {strides = array<i32>} : memref<8x128xf32, #tpu.memory_space<vmem>>, vector<1x128xf32>,
    %c2 = arith.constant 2 : index
    %c0_23 = arith.constant 0 : index
    %55 = vector.load %arg6[%c2, %c0_23] : memref<8x128xf32, #tpu.memory_space<vmem>>, vector<1x128xf32>
    %cst_24 = arith.constant dense<0.000000e+00> : vector<128xf32>
    %56 = vector.multi_reduction <add>, %43, %cst_24 [0] : vector<8x128xf32> to vector<128xf32>
    %57 = vector.shape_cast %56 : vector<128xf32> to vector<1x128xf32>
    %58 = arith.addf %55, %57 : vector<1x128xf32>
    %c2_25 = arith.constant 2 : index
    %c0_26 = arith.constant 0 : index
    %59 = vector.load %arg6[%c2_25, %c0_26] : memref<8x128xf32, #tpu.memory_space<vmem>>, vector<1x128xf32>
    tpu.vector_store %arg6[%c2_25, %c0_26], %58 {strides = array<i32>} : memref<8x128xf32, #tpu.memory_space<vmem>>, vector<1x128xf32>,
    %c3 = arith.constant 3 : index
    %c0_27 = arith.constant 0 : index
    %60 = vector.load %arg6[%c3, %c0_27] : memref<8x128xf32, #tpu.memory_space<vmem>>, vector<1x128xf32>
    %cst_28 = arith.constant dense<0.000000e+00> : vector<128xf32>
    %61 = vector.multi_reduction <add>, %22, %cst_28 [0] : vector<8x128xf32> to vector<128xf32>
    %62 = vector.shape_cast %61 : vector<128xf32> to vector<1x128xf32>
    %63 = arith.addf %60, %62 : vector<1x128xf32>
    %c3_29 = arith.constant 3 : index
    %c0_30 = arith.constant 0 : index
    %64 = vector.load %arg6[%c3_29, %c0_30] : memref<8x128xf32, #tpu.memory_space<vmem>>, vector<1x128xf32>
    tpu.vector_store %arg6[%c3_29, %c0_30], %63 {strides = array<i32>} : memref<8x128xf32, #tpu.memory_space<vmem>>, vector<1x128xf32>,
    %c0_i32_31 = arith.constant 0 : i32
    %65 = arith.cmpi eq, %arg1, %c0_i32_31 : i32
    %66 = arith.extui %65 : i1 to i32
    %c0_i32_32 = arith.constant 0 : i32
    %67 = arith.cmpi ne, %66, %c0_i32_32 : i32
    scf.if %67 {
      %c0_33 = arith.constant 0 : index
      %c0_34 = arith.constant 0 : index
      %68 = vector.load %arg6[%c0_33, %c0_34] : memref<8x128xf32, #tpu.memory_space<vmem>>, vector<8x128xf32>
      %c0_35 = arith.constant 0 : index
      %c0_36 = arith.constant 0 : index
      %c0_37 = arith.constant 0 : index
      %69 = vector.load %arg5[%c0_35, %c0_36, %c0_37] : memref<1x8x128xf32, #tpu.memory_space<vmem>>, vector<1x8x128xf32>
      %70 = vector.shape_cast %69 : vector<1x8x128xf32> to vector<8x128xf32>
      %71 = vector.shape_cast %68 : vector<8x128xf32> to vector<1x8x128xf32>
      tpu.vector_store %arg5[%c0_35, %c0_36, %c0_37], %71 {strides = array<i32>} : memref<1x8x128xf32, #tpu.memory_space<vmem>>, vector<1x8x128xf32>,
    } else {
    }
    return
  }
  func.func @transform_0(%arg0: i32, %arg1: i32) -> (i32, i32, i32) {
    %c0_i32 = arith.constant 0 : i32
    %c0_i32_0 = arith.constant 0 : i32
    return %arg0, %arg1, %c0_i32 : i32, i32, i32
  }
  func.func @transform_1(%arg0: i32, %arg1: i32) -> (i32, i32, i32) {
    %c0_i32 = arith.constant 0 : i32
    %c0_i32_0 = arith.constant 0 : i32
    return %arg0, %arg1, %c0_i32 : i32, i32, i32
  }
  func.func @transform_2(%arg0: i32, %arg1: i32) -> (i32, i32, i32) {
    %c0_i32 = arith.constant 0 : i32
    %c0_i32_0 = arith.constant 0 : i32
    return %arg0, %arg1, %c0_i32 : i32, i32, i32
  }
  func.func @transform_3(%arg0: i32, %arg1: i32) -> (i32, i32, i32) {
    %c0_i32 = arith.constant 0 : i32
    %c0_i32_0 = arith.constant 0 : i32
    %c0_i32_1 = arith.constant 0 : i32
    return %arg0, %c0_i32, %c0_i32_0 : i32, i32, i32
  }
}

</mosaic_0001>

<bundles_post_ra>
// kernel: tpu_custom_call.1
= control target key start
LH: loop header
LB: loop body
LE: loop exit
PB: predicated region body
PF: predicated region fallthrough
CT: control target
= control target key end

     0   :  { %s990_s0 = inlined_call_operand.hbm [shape: f32[2,8,128], index: 0, kind: input, shape index: {}]   ;;  %s991_s1 = inlined_call_operand.hbm [shape: f32[2,8,128], index: 1, kind: input, shape index: {}]   ;;  %s992_s2 = inlined_call_operand.hbm [shape: f32[2,8,128], index: 2, kind: input, shape index: {}]   ;;  %s993_s3 = inlined_call_operand.hbm [shape: f32[2,8,128], index: 3, kind: output, shape index: {}]  }
   0x1   :  { %996 = sst [smem:[#allocation16_spill]] %s991_s1 }
   0x2   :  { %8 = vsyncpa [#allocation4], 0 }
   0x3   :  { %10 = vsyncpa [#allocation4 + $0x1], 0 }
   0x4   :  { %11 = vsyncpa [#allocation7], 0 }
   0x5   :  { %13 = vsyncpa [#allocation7 + $0x1], 0 }
   0x6   :  { %14 = vsyncpa [#allocation5], 0 }
   0x7   :  { %16 = vsyncpa [#allocation5 + $0x1], 0  ;;  %s828_s12 = smov 0   ;;  %s830_s13 = smov 0  }
   0x8   :  { %s832_s14 = smov 0   ;;  %s834_s15 = smov 0  }
   0x9   :  { %s836_s16 = smov 0   ;;  %s838_s17 = smov 0  }
   0xa LB: > { %997 = sst [smem:[#allocation13_spill]] %s801_s16  ;;  %s859_s18 = sadd.s32 4294967295, %s805_s17   ;;  %s805_s17 = sphi %s838_s17, %s22_s17   ;;  %s801_s16 = sphi %s836_s16, %s1009_s16   ;;  %s797_s15 = sphi %s834_s15, %s1008_s15   ;;  %s793_s14 = sphi %s832_s14, %s1012_s14   ;;  %s789_s13 = sphi %s830_s13, %s1011_s13   ;;  %s785_s12 = sphi %s828_s12, %s1010_s12  }
   0xb   : > { %s528_s19 = sadd.s32 4294967294, %s805_s17   ;;  %s34_s20 = sadd.s32 1, %s801_s16 }
   0xc   : > { %s43_s21 = sadd.s32 1, %s793_s14  ;;  %p36_p0 = scmp.ge.s32.totalorder %s34_s20, 2 }
   0xd   : > { %p50_p1 = scmp.ne.s32.totalorder %s793_s14, %s789_s13  ;;  %p51_p2 = scmp.eq.s32.totalorder %s805_s17, 0 }
   0xe   : > { %p56_p3 = scmp.ne.s32.totalorder %s789_s13, %s785_s12  ;;  %s1014_s20 = smov (%p36_p0, %s34_s20), 0 }
   0xf   : > { %998 = sst [smem:[#allocation14_spill]] %s1014_s20  ;;  %p871_p4 = por %p51_p2, %p50_p1 }
  0x10   : > { %p57_p5 = scmp.eq.s32.totalorder %s859_s18, 0  ;;  %s38_s23 = ssub.s32 %s801_s16, %s1014_s20 }
  0x11   : > { %p136_p6 = scmp.eq.s32.totalorder %s859_s18, 1  ;;  %p41_p7 = scmp.eq.s32.totalorder %s38_s23, 0 }
  0x12   : > { %p879_p8 = por %p57_p5, %p56_p3  ;;  %p142_p10 = scmp.eq.s32.totalorder %s528_s19, 1 }
  0x13   : > { %p883_p9 = por %p136_p6, %p50_p1  ;;  %p530_p12 = scmp.ge.s32.totalorder %s805_s17, 2 }
  0x14   : > { %s888_s26 = scalar_select %p41_p7, %s793_s14, %s43_s21  }
  0x15   : > { %p890_p11 = por %p142_p10, %p56_p3  ;;  %p570_p13 = scmp.lt.s32.totalorder %s805_s17, 2 }
  0x16   : > { %1002 = sst [smem:[#allocation15_spill]] %s888_s26  ;;  %s162_s28 = sand.u32 1, %s793_s14  }
  0x17   : > { %s531_s29 = sshll.u32 %s162_s28, 3  ;;  %s532_s30 = sshll.u32 %s801_s16, 3 }
  0x18   : > { %p900_p0 = pnand %p570_p13, %p871_p4  ;;  %s182_s5 = sand.u32 1, %s805_s17  }
  0x19   : > { %s1005_s1 = sld [smem:[#allocation16_spill]]  ;;  %s186_s10 = scalar_lea.vmem [#allocation6], %s531_s29 }
  0x1a   : > { %s195_s11 = sshll.u32 %s186_s10, 4  ;;  %s183_s19 = scalar_lea.sflag [#allocation7], %s182_s5  ;;  %s196_s11 = int_to_ptr.vmem [resolvable:$true] %s195_s11 }
  0x1b   : > { %p537_p1 = scmp.ge.s32.totalorder %s805_s17, 1  ;;  %p220_p2 = scmp.lt.s32.totalorder %s805_s17, 3 }
  0x1c   : > { %s171_s6 = scalar_lea.hbm %s990_s0, %s532_s30  ;;  %s163_s10 = scalar_lea.sflag [#allocation4], %s162_s28 }
  0x1d   : > { %p912_p3 = pnand %p537_p1, %p220_p2  ;;  %s173_s7 = sshll.u32 %s171_s6, 4  ;;  %s174_s7 = int_to_ptr.hbm [resolvable:$true] %s173_s7 }
  0x1e   : > { %s206_s16 = scalar_lea.vmem [#allocation8], %s531_s29  ;;  %s929_s22 = sand.u32 (!%p912_p3), 1, %s789_s13  }
  0x1f   : > { %s191_s8 = scalar_lea.hbm %s1005_s1, %s532_s30  ;;  %s215_s26 = sshll.u32 %s206_s16, 4  ;;  %s216_s26 = int_to_ptr.vmem [resolvable:$true] %s215_s26 }
  0x20   : > { %s193_s9 = sshll.u32 %s191_s8, 4  ;;  %s166_s8 = scalar_lea.vmem [#allocation3], %s531_s29  ;;  %s194_s9 = int_to_ptr.hbm [resolvable:$true] %s193_s9 }
  0x21   : > { %562 = dma.hbm_to_vmem [thread:$0]  (!%p900_p0), %s194_s9, 128, %s196_s11, %s183_s19  }
  0x22   : > { %s175_s1 = sshll.u32 %s166_s8, 4  ;;  %s211_s11 = scalar_lea.hbm %s992_s2, %s532_s30  ;;  %s176_s1 = int_to_ptr.vmem [resolvable:$true] %s175_s1 }
  0x23   : > { %559 = dma.hbm_to_vmem [thread:$0]  (!%p900_p0), %s174_s7, 128, %s176_s1, %s163_s10  }
  0x24   : > { %s213_s20 = sshll.u32 %s211_s11, 4  ;;  %224 = sbr.rel (%p912_p3) target bundleno = 111 (0x6f), region = 32  ;;  %s214_s20 = int_to_ptr.hbm [resolvable:$true] %s213_s20 }
  0x25   : > { %565 = dma.hbm_to_vmem [thread:$0]  (!%p900_p0), %s214_s20, 128, %s216_s26, %s183_s19  }
  0x26   : > { %s932_s1 = sshll.u32 (!%p912_p3), %s929_s22, 3  ;;  %s227_s28 = scalar_lea.sflag (!%p912_p3), [#allocation4], %s929_s22 }
  0x27   : > { %s230_s30 = scalar_lea.vmem (!%p912_p3), [#allocation3], %s932_s1 }
  0x29   : > { %772 = dma.done.wait (%p879_p8), %s227_s28, 128  }
  0x2a   : > { %774 = vsyncadd (%p879_p8), %s227_s28, 4294967168  ;;  %s236_s16 = sand.u32 1, %s859_s18   ;;  %s240_s26 = scalar_lea.vmem [#allocation6], %s932_s1 }
  0x2b   : > { %s237_s20 = scalar_lea.sflag [#allocation7], %s236_s16 }
  0x2c   : > { %776 = dma.done.wait (%p879_p8), %s237_s20, 256  }
  0x2d   : > { %778 = vsyncadd (%p879_p8), %s237_s20, 4294967040  ;;  %v291_v0 = vlaneseq  ;;  %v807_v1 = vmov 0.0   ;;  %v289_v6 = vld [vmem:[%s230_s30] sm:$0xff]  ;;  %v290_v7 = vld [vmem:[%s240_s26] sm:$0xff]  ;;  %s250_s18 = scalar_lea.vmem [#allocation8], %s932_s1  ;;  %s545_s24 = sshll.u32 %s797_s15, 3 }
  0x2e   : > { %288 = vst [vmem:[#allocation2] sm:$0xff] %v807_v1  ;;  %v322_v39 = vld [vmem:[%s250_s18] sm:$0xff]  ;;  %s398_s19 = scalar_lea.hbm %s993_s3, %s545_s24  ;;  %s283_s21 = scalar_lea.vmem [#allocation9], %s932_s1 }
  0x2f   : > { %v292_v2 = vshrl.u32 %v291_v0, 7  ;;  %v294_v3 = vand.u32 127, %v291_v0  ;;  %s400_s23 = sshll.u32 %s283_s21, 4  ;;  %s402_s6 = sshll.u32 %s398_s19, 4  ;;  %s401_s23 = int_to_ptr.vmem [resolvable:$true] %s400_s23  ;;  %s403_s6 = int_to_ptr.hbm [resolvable:$true] %s402_s6 }
  0x30   : > { %s388_s7 = scalar_lea.sflag [#allocation5], %s929_s22  ;;  %s733_s8 = sshra.s32 %s403_s6, 4  ;;  %s734_s8 = int_to_ptr.hbm [resolvable:$true] %s733_s8 }
  0x31   : > { %v298_v4 = vmul.u32 128, %v292_v2  ;;  %s735_s10 = scalar_lea.hbm %s734_s8, 8  ;;  %s739_s9 = scalar_lea.hbm %s993_s3, 16 }
  0x32   : > { %p736_p4 = scmp.ne.s32.totalorder %s734_s8, %s735_s10  ;;  %p740_p7 = scmp.lt.s32.totalorder %s734_s8, %s993_s3 }
  0x33   : > { %v299_v5 = vadd.s32 %v298_v4, %v294_v3  ;;  %p741_p8 = scmp.lt.s32.totalorder %s739_s9, %s735_s10 }
  0x34   : > { %p737_p5 = pnand %p736_p4, %p883_p9 }
  0x35   : > { %vm300_vm0 = vcmp.lt.s32.totalorder %v299_v5, 256  ;;  %v373_v21 = vld [vmem:[#allocation2 + $0x3] sm:$0x1]  ;;  %v346_v2 = vld [vmem:[#allocation2] sm:$0x1]  ;;  %p742_p10 = por %p741_p8, %p740_p7 }
  0x36   : > { %v303_v8 = vsel %vm300_vm0, %v289_v6, 0.0  ;;  %v304_v9 = vsel %vm300_vm0, %v290_v7, 0.0  ;;  %v323_v44 = vsel %vm300_vm0, %v322_v39, 0.0  ;;  %v542_v46 = vsel %vm300_vm0, 1.0, %v807_v1  ;;  %v355_v6 = vld [vmem:[#allocation2 + $0x1] sm:$0x1]  ;;  %p738_p6 = pneg %p737_p5 }
  0x37   : > { %v308_v10 = vand.u32 2147483647, %v303_v8  ;;  %v543_v11 = vmul.f32 -1.442695, %v303_v8  ;;  %v374_v12 = vrot.slane %v304_v9, 4  ;;  %v305_v29 = vmax.f32 %v303_v8, 0.0 }
  0x38   : > { %v306_v30 = vmul.f32 %v304_v9, %v303_v8  ;;  %v364_v7 = vld [vmem:[#allocation2 + $0x2] sm:$0x1]  ;;  %p743_p13 = pnand %p742_p10, %p738_p6 }
  0x39   : > { %v309_v13 = vsub.f32 0.0, %v308_v10  ;;  %621 = vpow2.f32 %v543_v11  ;;  %v375_v14 = vadd.f32 %v374_v12, %v304_v9 }
  0x3a   : > { %v307_v38 = vsub.f32 %v305_v29, %v306_v30 }
  0x3b   : > { %v310_v15 = vmul.f32 1.442695, %v309_v13  ;;  %v376_v16 = vrot.slane %v375_v14, 2 }
  0x3d   : > { %623 = vpow2.f32 %v310_v15  ;;  %v377_v17 = vadd.f32 %v376_v16, %v375_v14 }
  0x3f   : > { %v622_v18 = vpop.eup %621  ;;  %v378_v20 = vrot.slane %v377_v17, 1 }
  0x40   : > { %v328_v19 = vadd.f32 1.0, %v622_v18 }
  0x41   : > { %v379_v23 = vadd.f32 %v378_v20, %v377_v17 }
  0x42   : > { %625 = vrcp.f32 %v328_v19  ;;  %vm334_vm1 = vweird.f32 %v328_v19  ;;  %v340_v33 = vand.u32 2147483648, %v328_v19  ;;  %v338_v36 = vand.u32 2147483647, %v328_v19 }
  0x43   : > { %v624_v22 = vpop.eup %623  ;;  %v380_v26 = vadd.f32 %v379_v23, %v373_v21 }
  0x44   : > { %v312_v24 = vadd.f32 1.0, %v624_v22  ;;  %v315_v25 = vmul.f32 -0.5, %v624_v22  ;;  %v318_v31 = vand.u32 2147483647, %v624_v22  ;;  %v341_v42 = vor.u32 1.1754944e-38, %v340_v33 }
  0x45   : > { %381 = vst [vmem:[#allocation2 + $0x3] sm:$0x1] %v380_v26  ;;  %vm339_vm5 = vcmp.eq.f32.partialorder %v338_v36, 8.507059e+37 }
  0x46   : > { %627 = vlog2.f32 %v312_v24  ;;  %v316_v27 = vadd.f32 1.0, %v315_v25  ;;  %vm319_vm3 = vcmp.lt.f32.partialorder %v318_v31, 0.0004427343 }
  0x48   : > { %v626_v28 = vpop.eup %625  ;;  %v317_v34 = vmul.f32 %v624_v22, %v316_v27 }
  0x49   : > { %v330_v32 = vmul.f32 %v626_v28, %v328_v19  ;;  %vm335_vm2 = vweird.f32 %v626_v28 }
  0x4a   : > { %vm336_vm4 = vmor %vm334_vm1, %vm335_vm2 }
  0x4b   : > { %v331_v35 = vsub.f32 1.0, %v330_v32 }
  0x4c   : > { %v628_v37 = vpop.eup %627 }
  0x4d   : > { %v314_v40 = vmul.f32 0.6931472, %v628_v37  ;;  %v332_v41 = vmul.f32 %v626_v28, %v331_v35 }
  0x4f   : > { %v320_v43 = vsel %vm319_vm3, %v317_v34, %v314_v40  ;;  %v333_v45 = vadd.f32 %v626_v28, %v332_v41 }
  0x50   : > { %v321_v47 = vadd.f32 %v320_v43, %v307_v38 }
  0x51   : > { %v337_v48 = vsel %vm336_vm4, %v626_v28, %v333_v45 }
  0x52   : > { %v324_v49 = vmul.f32 %v323_v44, %v321_v47  ;;  %v342_v50 = vsel %vm339_vm5, %v341_v42, %v337_v48 }
  0x53   : > { %v344_v51 = vmul.f32 %v542_v46, %v342_v50  ;;  %v345_v52 = vmul.f32 %v342_v50, %v304_v9 }
  0x54   : > { %v347_v53 = vrot.slane %v324_v49, 4 }
  0x55   : > { %v356_v54 = vrot.slane %v345_v52, 4  ;;  %v365_v55 = vrot.slane %v344_v51, 4 }
  0x56   : > { %v348_v56 = vadd.f32 %v347_v53, %v324_v49 }
  0x57   : > { %v357_v57 = vadd.f32 %v356_v54, %v345_v52  ;;  %v366_v58 = vadd.f32 %v365_v55, %v344_v51 }
  0x58   : > { %v349_v59 = vrot.slane %v348_v56, 2 }
  0x59   : > { %v358_v60 = vrot.slane %v357_v57, 2  ;;  %v367_v61 = vrot.slane %v366_v58, 2 }
  0x5a   : > { %v350_v62 = vadd.f32 %v349_v59, %v348_v56 }
  0x5b   : > { %v368_v63 = vadd.f32 %v367_v61, %v366_v58  ;;  %v359_v0 = vadd.f32 %v358_v60, %v357_v57 }
  0x5c   : > { %v351_v1 = vrot.slane %v350_v62, 1 }
  0x5d   : > { %v360_v3 = vrot.slane %v359_v0, 1  ;;  %v369_v4 = vrot.slane %v368_v63, 1 }
  0x5e   : > { %v352_v5 = vadd.f32 %v351_v1, %v350_v62 }
  0x5f   : > { %v361_v8 = vadd.f32 %v360_v3, %v359_v0  ;;  %v370_v9 = vadd.f32 %v369_v4, %v368_v63 }
  0x60   : > { %v353_v10 = vadd.f32 %v352_v5, %v346_v2 }
  0x61   : > { %v362_v11 = vadd.f32 %v361_v8, %v355_v6  ;;  %v371_v12 = vadd.f32 %v370_v9, %v364_v7 }
  0x62   : > { %354 = vst [vmem:[#allocation2] sm:$0x1] %v353_v10 }
  0x63   : > { %363 = vst [vmem:[#allocation2 + $0x1] sm:$0x1] %v362_v11 }
  0x64   : > { %372 = vst [vmem:[#allocation2 + $0x2] sm:$0x1] %v371_v12 }
  0x6b   : > { %v385_v13 = vld [vmem:[#allocation2] sm:$0xff] }
  0x6c   : > { %386 = vst [vmem:[%s283_s21] sm:$0xff] %v385_v13 }
  0x6d   : > { %746 = shalt.err (!%p743_p13)
}
  0x6e   : > { %554 = dma.vmem_to_hbm [thread:$0]  (%p883_p9), %s401_s23, 128, %s403_s6, %s388_s7  }
  0x6f PF: > { %s414_s22 = sand.u32 1, %s785_s12   ;;  %p567_p0 = pnand %p530_p12, %p890_p11 }
  0x70   : > { %s415_s28 = scalar_lea.sflag [#allocation5], %s414_s22 }
  0x71   : > { %p568_p1 = pneg %p567_p0 }
  0x73   : > { %780 = dma.done.wait (%p568_p1), %s415_s28, 128  }
  0x74   : > { %782 = vsyncadd (%p568_p1), %s415_s28, 4294967168  ;;  %s22_s17 = sadd.s32 1, %s805_s17   ;;  %s1007_s30 = sld [smem:[#allocation15_spill]] }
  0x75   : > { %p19_p2 = scmp.ge.s32.totalorder %s22_s17, 4   ;;  %s1008_s15 = sld [smem:[#allocation13_spill]] }
  0x76   : > { %s1009_s16 = sld [smem:[#allocation14_spill]]  ;;  %s1010_s12 = smov %s789_s13 }
  0x77   : > { %s1011_s13 = smov %s793_s14  ;;  %21 = sbr.rel (!%p19_p2) target bundleno = 10 (0xa), region = 109 }
  0x7a   : > { %s1012_s14 = smov %s1007_s30 }
  0x7c   :  { %421 = vsyncpa [#allocation4], 1 }
  0x7d   :  { %423 = vsyncpa [#allocation4 + $0x1], 1 }
  0x7e   :  { %424 = vsyncpa [#allocation7], 1 }
  0x7f   :  { %426 = vsyncpa [#allocation7 + $0x1], 1 }
  0x80   :  { %427 = vsyncpa [#allocation5], 1 }
  0x81   :  { %429 = vsyncpa [#allocation5 + $0x1], 1 }

</bundles_post_ra>
